<compile_context>
chip_gen: v7x
topology: tpu7x:2x2x1
jax: 0.10.0
libtpu: 0.0.40
codegen_flags: <defaults>
</compile_context>

<pallas_src>
import functools

import numpy as np

import jax
import jax.numpy as jnp
from jax.experimental import pallas as pl
from jax.experimental.pallas import tpu as pltpu


_PAD_DIST = 1e30  # exp(neg_inv_2sigma * 1e30) == 0 -> padded rows contribute nothing


# ----------------------------------------------------------------------------- kernel

def _spatial_attn_kernel(t_ref, dist_ref, res_ref, out_ref, *, neg_inv_2sigma):
    # attention_3d = exp(-distance / (2 * sigma_3d)) for this column tile (f32, EUP).
    attn = jnp.exp(dist_ref[0].astype(jnp.float32) * neg_inv_2sigma)          # (N_pad, TN)

    # Per-column normalizer: exact f32 column sum (VPU slack slot) + approx recip (EUP).
    inv_norm = pl.reciprocal(jnp.sum(attn, axis=0, keepdims=True), approx=True)  # (1, TN)

    # Single long-K MXU matmul: (C, N_pad) @ (N_pad, TN), f32 accumulation.
    agg = jnp.dot(t_ref[0], attn.astype(t_ref.dtype),
                  preferred_element_type=jnp.float32)                          # (C, TN)

    # out = gamma*conv1(cat(ca_conv(ca), context_conv(x))) + x, fully folded on host:
    #   agg*inv_norm is the attention branch; res = Bm@x + bias + x is everything else.
    out_ref[0] = (agg * inv_norm + res_ref[0]).astype(out_ref.dtype)


# ----------------------------------------------------------------------------- params

def fold_conv_bn(w, b, bn_w, bn_b, bn_mean, bn_var, eps=1e-5):
    """Fold eval-mode BatchNorm into a 1x1 conv: y = (Wx + b - mean)/sqrt(var+eps)*g + beta."""
    scale = bn_w / jnp.sqrt(bn_var + eps)
    return w * scale[:, None], scale * (b - bn_mean) + bn_b


def init_params(key, in_dim, out_dim, radii=0.3):
    assert in_dim == out_dim, "residual add requires in_dim == out_dim (512 in the original module)"
    C = in_dim
    ks = jax.random.split(key, 4)

    def conv(k, c_out, c_in):
        w = 0.1 * jax.random.normal(k, (c_out, c_in), jnp.float32)
        b = 0.01 * jax.random.normal(jax.random.fold_in(k, 1), (c_out,), jnp.float32)
        return w, b

    def bn(c):  # PyTorch BatchNorm2d default init / running stats
        return (jnp.ones((c,), jnp.float32), jnp.zeros((c,), jnp.float32),
                jnp.zeros((c,), jnp.float32), jnp.ones((c,), jnp.float32))

    value_w, value_b = conv(ks[0], out_dim, in_dim)
    ca_w, ca_b = conv(ks[1], C, C)
    ctx_w, ctx_b = conv(ks[2], C, C)
    c1_w, c1_b = conv(ks[3], C, 2 * C)

    return dict(
        gamma=jnp.float32(0.7),
        sigma_3d=jnp.float32(radii * 30.0 / 36.0),     # non-learnable
        value_w=value_w, value_b=value_b,
        ca_w=ca_w, ca_b=ca_b, ca_bn=bn(C),
        ctx_w=ctx_w, ctx_b=ctx_b, ctx_bn=bn(C),
        c1_w=c1_w, c1_b=c1_b, c1_bn=bn(C),
    )


def _fused_weights(params):
    """Fold the whole 1x1-conv chain (and gamma) into M, Bm and a single bias."""
    C = params['value_w'].shape[0]
    wca, bca = fold_conv_bn(params['ca_w'], params['ca_b'], *params['ca_bn'])
    wctx, bctx = fold_conv_bn(params['ctx_w'], params['ctx_b'], *params['ctx_bn'])
    w1, b1 = fold_conv_bn(params['c1_w'], params['c1_b'], *params['c1_bn'])
    w1a, w1b = w1[:, :C], w1[:, C:]
    gamma = params['gamma']
    m = gamma * (w1a @ wca @ params['value_w'])
    bmat = gamma * (w1b @ wctx)
    bias = gamma * (w1a @ (wca @ params['value_b'] + bca) + w1b @ bctx + b1)
    return m, bmat, bias.reshape(-1, 1)


# ----------------------------------------------------------------------------- sizing

def _round_up(x, m):
    return ((x + m - 1) // m) * m


def _tpu_vmem_capacity_bytes():
    """Generation-aware physical VMEM; conservative 64 MiB (v7x per-TC) fallback."""
    cap = 64 * 1024 * 1024
    try:
        cap = int(pltpu.get_tpu_info().vmem_capacity_bytes)
    except Exception:
        pass
    return cap


def _block_vmem_bytes(c, n_pad, tn, t_bytes, dist_bytes):
    return (2 * c * n_pad * t_bytes          # t (double-buffered, resident per slice)
            + 2 * n_pad * tn * dist_bytes    # distance column tile
            + 2 * c * tn * 4                 # res column tile
            + 2 * c * tn * 4                 # out column tile
            + n_pad * tn * (4 + t_bytes))    # exp result + MXU-dtype copy temporaries


def _pick_col_tile(n_pad, c, t_bytes, dist_bytes, budget_bytes, tn_cap=None):
    """Largest TN (multiple of 128 dividing n_pad) whose live set fits the budget."""
    cap = n_pad if tn_cap is None else max(128, min(tn_cap, n_pad))
    best, tn = 128, 128
    while tn <= cap:
        if n_pad % tn == 0 and _block_vmem_bytes(c, n_pad, tn, t_bytes, dist_bytes) <= budget_bytes:
            best = tn
        tn += 128
    return best


# ----------------------------------------------------------------------------- wrapper

def spatial_attn_forward(params, context_feature, distance, *,
                         compute_dtype=jnp.bfloat16, dist_dtype=None,
                         tn_cap=None, vmem_budget_bytes=None):
    B, V, C, H, W = context_feature.shape
    N = H * W
    BV = B * V
    if dist_dtype is None:
        dist_dtype = compute_dtype

    x = context_feature.reshape(BV, C, N).astype(jnp.float32)
    dist = distance.reshape(BV, N, N)

    m, bmat, bias = _fused_weights(params)
    sigma = float(params['sigma_3d'])                  # non-learnable -> compile-time const
    neg_inv_2sigma = -1.0 / (2.0 * sigma)

    # Hoisted host-side work: one stacked [M; Bm] @ x batched matmul (O(C^2 N)).
    mb = jnp.concatenate([m, bmat], axis=0)                         # (2C, C)
    tx = jnp.einsum('oc,bcn->bon', mb, x)                           # (BV, 2C, N) f32
    t = tx[:, :C, :].astype(compute_dtype)                          # MXU LHS (bf16 default)
    res = tx[:, C:, :] + bias[None] + x                             # f32 epilogue + residual

    # Pad the pixel axes to a multiple of 128.  Padded K rows get a huge distance so
    # attn -> 0 (agg and normalizer untouched); padded output columns are dropped below.
    n_pad = _round_up(N, 128)
    if n_pad != N:
        pad = n_pad - N
        t = jnp.pad(t, ((0, 0), (0, 0), (0, pad)))                  # zero K cols -> no contribution
        res = jnp.pad(res, ((0, 0), (0, 0), (0, pad)))
        dist = jnp.pad(dist, ((0, 0), (0, pad), (0, 0)), constant_values=_PAD_DIST)
        dist = jnp.pad(dist, ((0, 0), (0, 0), (0, pad)))
    dist = dist.astype(dist_dtype)    # bf16 default: halves the O(N^2) HBM stream + VMEM

    t_bytes = np.dtype(compute_dtype).itemsize
    d_bytes = np.dtype(dist_dtype).itemsize
    vmem_cap = _tpu_vmem_capacity_bytes()
    budget = vmem_budget_bytes if vmem_budget_bytes is not None else (vmem_cap * 3) // 5
    TN = _pick_col_tile(n_pad, C, t_bytes, d_bytes, budget, tn_cap)
    est = _block_vmem_bytes(C, n_pad, TN, t_bytes, d_bytes)
    vmem_limit = int(min(vmem_cap, max(32 * 1024 * 1024, est + 16 * 1024 * 1024)))

    kernel = functools.partial(_spatial_attn_kernel, neg_inv_2sigma=neg_inv_2sigma)

    out = pl.pallas_call(
        kernel,
        out_shape=jax.ShapeDtypeStruct((BV, C, n_pad), jnp.float32),
        grid=(BV, n_pad // TN),
        in_specs=[
            pl.BlockSpec((1, C, n_pad), lambda b, c: (b, 0, 0)),    # t = M@x (resident per slice)
            pl.BlockSpec((1, n_pad, TN), lambda b, c: (b, 0, c)),   # distance column tile
            pl.BlockSpec((1, C, TN), lambda b, c: (b, 0, c)),       # res = Bm@x + bias + x
        ],
        out_specs=pl.BlockSpec((1, C, TN), lambda b, c: (b, 0, c)),
        compiler_params=pltpu.CompilerParams(
            dimension_semantics=("parallel", "parallel"),
            vmem_limit_bytes=vmem_limit),
    )(t, dist, res)

    out = out[:, :, :N].reshape(B, V, C, H, W)
    # The caller only consumes the view-0 attention; reproduce it with a trivial
    # elementwise op instead of writing all B*V*N*N attention values back to HBM.
    attn0 = jnp.exp(distance.reshape(B, V, N, N)[:, 0].astype(jnp.float32) * neg_inv_2sigma)
    return out, attn0


# ----------------------------------------------------------------------------- reference

def spatial_attn_reference(params, context_feature, distance):
    """Pure-JAX reference mirroring the PyTorch forward (eval-mode BN, unfused convs)."""
    B, V, C, H, W = context_feature.shape
    N = H * W
    x = context_feature.reshape(B * V, C, N).astype(jnp.float32)
    dist = distance.reshape(B * V, N, N).astype(jnp.float32)

    attn = jnp.exp(-dist / (2.0 * params['sigma_3d']))
    pv = jnp.einsum('oc,bcn->bon', params['value_w'], x) + params['value_b'][None, :, None]
    norm = jnp.sum(attn, axis=1, keepdims=True)
    ca = jnp.einsum('bcn,bnm->bcm', pv, attn) / norm

    wca, bca = fold_conv_bn(params['ca_w'], params['ca_b'], *params['ca_bn'])
    wctx, bctx = fold_conv_bn(params['ctx_w'], params['ctx_b'], *params['ctx_bn'])
    w1, b1 = fold_conv_bn(params['c1_w'], params['c1_b'], *params['c1_bn'])
    ca_out = jnp.einsum('oc,bcn->bon', wca, ca) + bca[None, :, None]
    ctx_out = jnp.einsum('oc,bcn->bon', wctx, x) + bctx[None, :, None]
    cat = jnp.concatenate([ca_out, ctx_out], axis=1)
    fused = jnp.einsum('oc,bcn->bon', w1, cat) + b1[None, :, None]
    out = params['gamma'] * fused + x
    return out.reshape(B, V, C, H, W), attn.reshape(B, V, N, N)[:, 0, :, :]


# ----------------------------------------------------------------------------- test

if __name__ == "__main__":
    key = jax.random.PRNGKey(0)
    B, V, C, H, W = 2, 2, 8, 8, 32
    N = H * W

    k1, k2, k3 = jax.random.split(key, 3)
    params = init_params(k1, in_dim=C, out_dim=C, radii=0.3)

    context_feature = jax.random.normal(k2, (B, V, C, H, W), jnp.float32)
    # pair-wise euclidean distances are non-negative
    pts = jax.random.normal(k3, (B, V, N, 3), jnp.float32)
    distance = jnp.linalg.norm(pts[:, :, :, None, :] - pts[:, :, None, :, :], axis=-1)

    out_ref, attn_ref = spatial_attn_reference(params, context_feature, distance)

    # Fast path: bf16 t / bf16 distance, forced 2 column tiles of 128 lanes
    out, attn = spatial_attn_forward(params, context_feature, distance,
                                     compute_dtype=jnp.bfloat16, tn_cap=128)
    out, attn = jax.block_until_ready((out, attn))
    assert out.shape == (B, V, C, H, W) and attn.shape == (B, N, N)
    assert jnp.allclose(out, out_ref, atol=2e-2, rtol=2e-2)
    assert jnp.allclose(attn, attn_ref, atol=1e-5, rtol=1e-5)

    # Accurate path: f32 everywhere, auto-sized single column tile
    out32, attn32 = spatial_attn_forward(params, context_feature, distance,
                                         compute_dtype=jnp.float32, dist_dtype=jnp.float32)
    out32, attn32 = jax.block_until_ready((out32, attn32))
    assert jnp.allclose(out32, out_ref, atol=2e-3, rtol=2e-3)
    assert jnp.allclose(attn32, attn_ref, atol=1e-5, rtol=1e-5)

    # Non-128-divisible pixel count exercises the padding path (N=160 -> N_pad=256)
    Hp, Wp = 8, 20
    Np = Hp * Wp
    cf2 = jax.random.normal(jax.random.fold_in(k2, 7), (B, V, C, Hp, Wp), jnp.float32)
    pts2 = jax.random.normal(jax.random.fold_in(k3, 7), (B, V, Np, 3), jnp.float32)
    dist2 = jnp.linalg.norm(pts2[:, :, :, None, :] - pts2[:, :, None, :, :], axis=-1)
    out_ref2, attn_ref2 = spatial_attn_reference(params, cf2, dist2)
    out2, attn2 = spatial_attn_forward(params, cf2, dist2,
                                       compute_dtype=jnp.float32, dist_dtype=jnp.float32)
    out2, attn2 = jax.block_until_ready((out2, attn2))
    assert out2.shape == (B, V, C, Hp, Wp) and attn2.shape == (B, Np, Np)
    assert jnp.allclose(out2, out_ref2, atol=2e-3, rtol=2e-3)
    assert jnp.allclose(attn2, attn_ref2, atol=1e-5, rtol=1e-5)

    print("KERNEL_OK")
</pallas_src>

<mosaic_0001>
module attributes {stable_mosaic.version = 11 : i64} {
  func.func @_spatial_attn_kernel(%arg0: i32, %arg1: i32, %arg2: memref<1x8x256xbf16, #tpu.memory_space<vmem>>, %arg3: memref<1x256x128xbf16, #tpu.memory_space<vmem>>, %arg4: memref<1x8x128xf32, #tpu.memory_space<vmem>>, %arg5: memref<1x8x128xf32, #tpu.memory_space<vmem>>) attributes {dimension_semantics = [#tpu.dimension_semantics<parallel>, #tpu.dimension_semantics<parallel>], iteration_bounds = array<i64: 4, 2>, scalar_prefetch = 0 : i64, scratch_operands = 0 : i64, tpu.core_type = #tpu.core_type<tc>, window_params = [{transform_indices = @transform_0, window_bounds = array<i64: 1, 8, 256>}, {transform_indices = @transform_1, window_bounds = array<i64: 1, 256, 128>}, {transform_indices = @transform_2, window_bounds = array<i64: 1, 8, 128>}, {transform_indices = @transform_3, window_bounds = array<i64: 1, 8, 128>}]} {
    %c0 = arith.constant 0 : index
    %c0_0 = arith.constant 0 : index
    %c0_1 = arith.constant 0 : index
    %0 = vector.load %arg3[%c0, %c0_0, %c0_1] : memref<1x256x128xbf16, #tpu.memory_space<vmem>>, vector<1x256x128xbf16>
    %1 = vector.shape_cast %0 : vector<1x256x128xbf16> to vector<256x128xbf16>
    %2 = arith.extf %1 : vector<256x128xbf16> to vector<256x128xf32>
    %cst = arith.constant -2.000000e+00 : f32
    %3 = vector.broadcast %cst : f32 to vector<256x128xf32>
    %4 = arith.mulf %2, %3 : vector<256x128xf32>
    %5 = math.exp %4 : vector<256x128xf32>
    %cst_2 = arith.constant dense<0.000000e+00> : vector<128xf32>
    %6 = vector.multi_reduction <add>, %5, %cst_2 [0] : vector<256x128xf32> to vector<128xf32>
    %7 = vector.shape_cast %6 : vector<128xf32> to vector<1x128xf32>
    %8 = tpu.reciprocal %7 {approx = true} : vector<1x128xf32> -> vector<1x128xf32>
    %c0_3 = arith.constant 0 : index
    %c0_4 = arith.constant 0 : index
    %c0_5 = arith.constant 0 : index
    %9 = vector.load %arg2[%c0_3, %c0_4, %c0_5] : memref<1x8x256xbf16, #tpu.memory_space<vmem>>, vector<1x8x256xbf16>
    %10 = vector.shape_cast %9 : vector<1x8x256xbf16> to vector<8x256xbf16>
    %11 = arith.truncf %5 : vector<256x128xf32> to vector<256x128xbf16>
    %cst_6 = arith.constant dense<0.000000e+00> : vector<8x128xf32>
    %12 = tpu.matmul %10, %11, %cst_6 {dimension_numbers = #tpu.dot_dimension_numbers<[1], [0], [0], [1], [0, 0, 1, 1], [], []>} : vector<8x256xbf16>, vector<256x128xbf16>, vector<8x128xf32> -> vector<8x128xf32>
    %13 = vector.broadcast %8 : vector<1x128xf32> to vector<8x128xf32>
    %14 = arith.mulf %12, %13 : vector<8x128xf32>
    %c0_7 = arith.constant 0 : index
    %c0_8 = arith.constant 0 : index
    %c0_9 = arith.constant 0 : index
    %15 = vector.load %arg4[%c0_7, %c0_8, %c0_9] : memref<1x8x128xf32, #tpu.memory_space<vmem>>, vector<1x8x128xf32>
    %16 = vector.shape_cast %15 : vector<1x8x128xf32> to vector<8x128xf32>
    %17 = arith.addf %14, %16 : vector<8x128xf32>
    %c0_10 = arith.constant 0 : index
    %c0_11 = arith.constant 0 : index
    %c0_12 = arith.constant 0 : index
    %18 = vector.load %arg5[%c0_10, %c0_11, %c0_12] : memref<1x8x128xf32, #tpu.memory_space<vmem>>, vector<1x8x128xf32>
    %19 = vector.shape_cast %18 : vector<1x8x128xf32> to vector<8x128xf32>
    %20 = vector.shape_cast %17 : vector<8x128xf32> to vector<1x8x128xf32>
    tpu.vector_store %arg5[%c0_10, %c0_11, %c0_12], %20 {strides = array<i32>} : memref<1x8x128xf32, #tpu.memory_space<vmem>>, vector<1x8x128xf32>,
    return
  }
  func.func @transform_0(%arg0: i32, %arg1: i32) -> (i32, i32, i32) {
    %c0_i32 = arith.constant 0 : i32
    %c0_i32_0 = arith.constant 0 : i32
    %c0_i32_1 = arith.constant 0 : i32
    return %arg0, %c0_i32, %c0_i32_0 : i32, i32, i32
  }
  func.func @transform_1(%arg0: i32, %arg1: i32) -> (i32, i32, i32) {
    %c0_i32 = arith.constant 0 : i32
    %c0_i32_0 = arith.constant 0 : i32
    return %arg0, %c0_i32, %arg1 : i32, i32, i32
  }
  func.func @transform_2(%arg0: i32, %arg1: i32) -> (i32, i32, i32) {
    %c0_i32 = arith.constant 0 : i32
    %c0_i32_0 = arith.constant 0 : i32
    return %arg0, %c0_i32, %arg1 : i32, i32, i32
  }
  func.func @transform_3(%arg0: i32, %arg1: i32) -> (i32, i32, i32) {
    %c0_i32 = arith.constant 0 : i32
    %c0_i32_0 = arith.constant 0 : i32
    return %arg0, %c0_i32, %arg1 : i32, i32, i32
  }
}

</mosaic_0001>

<bundles_post_ra>
// kernel: tpu_custom_call.1
= control target key start
LH: loop header
LB: loop body
LE: loop exit
PB: predicated region body
PF: predicated region fallthrough
CT: control target
= control target key end

     0   :  { %s1654_s0 = inlined_call_operand.hbm [shape: bf16[4,8,256], index: 0, kind: input, shape index: {}]   ;;  %s1655_s1 = inlined_call_operand.hbm [shape: bf16[4,256,256], index: 1, kind: input, shape index: {}]   ;;  %s1656_s2 = inlined_call_operand.hbm [shape: f32[4,8,256], index: 2, kind: input, shape index: {}]   ;;  %s1657_s3 = inlined_call_operand.hbm [shape: f32[4,8,256], index: 3, kind: output, shape index: {}]  }
   0x1   :  { %1672 = sst [smem:[#allocation20_spill]] %s1654_s0 }
   0x2   :  { %1673 = sst [smem:[#allocation21_spill]] %s1655_s1 }
   0x3   :  { %8 = vsyncpa [#allocation3], 0 }
   0x4   :  { %10 = vsyncpa [#allocation3 + $0x1], 0 }
   0x5   :  { %11 = vsyncpa [#allocation6], 0 }
   0x6   :  { %13 = vsyncpa [#allocation6 + $0x1], 0 }
   0x7   :  { %14 = vsyncpa [#allocation4], 0 }
   0x8   :  { %16 = vsyncpa [#allocation4 + $0x1], 0  ;;  %s1250_s12 = smov 0   ;;  %s1252_s13 = smov 0  }
   0x9   :  { %s1254_s14 = smov 0   ;;  %s1256_s15 = smov 0  }
   0xa   :  { %s1258_s16 = smov 0   ;;  %s1260_s17 = smov 0  }
   0xb   :  { %s1262_s18 = smov 0   ;;  %s1264_s19 = smov 0  }
   0xc   :  { %s1266_s20 = smov 0   ;;  %s1268_s21 = smov 0  }
   0xd   :  { %s1270_s22 = smov 0  }
   0xe LB: > { %1674 = sst [smem:[#allocation12_spill]] %s1181_s12  ;;  %s31_s23 = sadd.s32 1, %s1213_s20  ;;  %s1221_s22 = sphi %s1270_s22, %s22_s22   ;;  %s1217_s21 = sphi %s1268_s21, %s1719_s21   ;;  %s1213_s20 = sphi %s1266_s20, %s1718_s20   ;;  %s1209_s19 = sphi %s1264_s19, %s1717_s19   ;;  %s1205_s18 = sphi %s1262_s18, %s1716_s18   ;;  %s1201_s17 = sphi %s1260_s17, %s1709_s17   ;;  %s1197_s16 = sphi %s1258_s16, %s1715_s16   ;;  %s1193_s15 = sphi %s1256_s15, %s1714_s15   ;;  %s1189_s14 = sphi %s1254_s14, %s1707_s14   ;;  %s1185_s13 = sphi %s1252_s13, %s1713_s13   ;;  %s1181_s12 = sphi %s1250_s12, %s1712_s12  }
   0xf   : > { %1675 = sst [smem:[#allocation13_spill]] %s1189_s14  ;;  %p1660_p0 = scmp.eq.s32.totalorder %s1221_s22, 0 }
  0x10   : > { %1676 = sst [smem:[#allocation14_spill]] %s1201_s17  ;;  %p1307_p1 = scmp.ge.s32.totalorder %s31_s23, 2 }
  0x11   : > { %s69_s25 = sadd.s32 1, %s1189_s14  ;;  %p1659_p2 = scmp.ne.s32.totalorder %s1189_s14, %s1185_s13 }
  0x12   : > { %s1721_s23 = smov (%p1307_p1, %s31_s23), 0  ;;  %p1658_p4 = scmp.lt.s32.totalorder %s1221_s22, 8 }
  0x13   : > { %1678 = sst [smem:[#allocation15_spill]] %s1721_s23  ;;  %p78_p3 = por %p1659_p2, %p1660_p0 }
  0x14   : > { %s181_s26 = sand.u32 1, %s1221_s22   ;;  %s1661_s27 = sand.u32 1, %s1189_s14  }
  0x15   : > { %s702_s28 = sshll.u32 %s1661_s27, 7  ;;  %s703_s29 = sshll.u32 %s1217_s21, 6 }
  0x16   : > { %s190_s30 = sadd.s32 %s1213_s20, %s703_s29  ;;  %s185_s4 = scalar_lea.vmem [#allocation5], %s702_s28 }
  0x17   : > { %s193_s5 = sshll.u32 %s185_s4, 4  ;;  %s704_s6 = sshll.u32 %s190_s30, 6  ;;  %s1330_s5 = int_to_ptr.vmem [resolvable:$true] %s193_s5 }
  0x18   : > { %s1679_s1 = sld [smem:[#allocation21_spill]]  ;;  %p1339_p5 = pnand %p1658_p4, %p78_p3 }
  0x19   : > { %s1343_s11 = scalar_lea.sflag [#allocation6], %s181_s26 }
  0x1a   : > { %p1664_p7 = pneg %p1339_p5 }
  0x1e   : > { %s1335_s9 = scalar_lea.hbm %s1679_s1, %s704_s6  ;;  %s1010_s4 = scalar_lea.hbm %s1679_s1, 16384 }
  0x1f   : > { %s1005_s28 = scalar_lea.hbm %s1335_s9, 2048  ;;  %p1011_p10 = scmp.lt.u32.totalorder %s1335_s9, %s1679_s1 }
  0x20   : > { %p1006_p6 = scmp.ne.s32.totalorder %s1335_s9, %s1005_s28  ;;  %p1012_p11 = scmp.lt.u32.totalorder %s1010_s4, %s1005_s28 }
  0x21   : > { %p1014_p13 = scmp.lt.u32.totalorder %s1005_s28, %s1335_s9 }
  0x22   : > { %p1008_p8 = pnand %p1664_p7, %p1006_p6  ;;  %p1013_p12 = por %p1012_p11, %p1011_p10 }
  0x24   : > { %p1009_p9 = pneg %p1008_p8  ;;  %p1015_p3 = por %p1014_p13, %p1013_p12 }
  0x26   : > { %p1016_p4 = pnand %p1015_p3, %p1009_p9 }
  0x28   : > { %1019 = shalt.err (!%p1016_p4)
}
  0x29   : > { %s1020_s26 = scalar_lea.vmem %s1330_s5, 2048  ;;  %s1223_s8 = smov [#allocation5]  }
  0x2a   : > { %p1021_p6 = scmp.ne.s32.totalorder %s1330_s5, %s1020_s26  ;;  %s1025_s29 = sshll.u32 %s1223_s8, 4  ;;  %s1026_s29 = int_to_ptr.vmem [resolvable:$false] %s1025_s29 }
  0x2b   : > { %s1027_s30 = scalar_lea.vmem %s1026_s29, 4096  ;;  %p1028_p0 = scmp.lt.s32.totalorder %s1330_s5, %s1026_s29 }
  0x2c   : > { %p1023_p8 = pnand %p1021_p6, %p1664_p7  ;;  %p1029_p10 = scmp.lt.s32.totalorder %s1027_s30, %s1020_s26 }
  0x2e   : > { %p1024_p2 = pneg %p1023_p8  ;;  %p1030_p11 = por %p1029_p10, %p1028_p0 }
  0x30   : > { %p1031_p12 = pnand %p1030_p11, %p1024_p2 }
  0x32   : > { %1034 = shalt.err (!%p1031_p12)
}
  0x33   : > { %s1224_s28 = smov 128   ;;  %s1225_s4 = smov 64  }
  0x34   : > { %s1226_s6 = smov 4   ;;  %p708_p0 = scmp.ge.s32.totalorder %s1221_s22, 1 }
  0x35   : > { %836 = dma.hbm_to_vmem [thread:$0]  (!%p1339_p5), %s1335_s9, 2048, %s1330_s5, %s1343_s11, %s1224_s28, %s1225_s4, %s1226_s6  }
  0x36   : > { %p221_p2 = scmp.lt.s32.totalorder %s1221_s22, 9  ;;  %s1378_s26 = sadd.s32 4294967295, %s1221_s22  }
  0x37   : > { %s696_s8 = sadd.s32 4294967294, %s1221_s22   ;;  %s34_s29 = sadd.s32 1, %s1217_s21 }
  0x38   : > { %p1373_p4 = pnand %p708_p0, %p221_p2  ;;  %s1723_s29 = smov (!%p1307_p1, %s34_s29), %s1217_s21 }
  0x39   : > { %s41_s5 = sadd.s32 1, %s1201_s17  ;;  %p48_p9 = scmp.ne.s32.totalorder %s1201_s17, %s1197_s16 }
  0x3a   : > { %s1681_s7 = scalar_select %p1373_p4, 1, 0 }
  0x3b   : > { %p36_p13 = scmp.ge.s32.totalorder %s1723_s29, 4  ;;  %p54_p3 = scmp.ne.s32.totalorder %s1197_s16, %s1193_s15 }
  0x3c   : > { %p1682_p6 = scmp.eq.s32.totalorder %s1221_s22, 0  ;;  %p55_p10 = scmp.eq.s32.totalorder %s1378_s26, 0 }
  0x3d   : > { %s1725_s29 = smov (%p36_p13, %s1723_s29), 0  ;;  %s65_s30 = ssub.s32 %s1213_s20, %s1721_s23 }
  0x3e   : > { %p1392_p8 = por %p1682_p6, %p48_p9  ;;  %1684 = sst [smem:[#allocation16_spill]] %s1725_s29 }
  0x3f   : > { %p1399_p1 = por %p55_p10, %p54_p3  ;;  %s38_s28 = ssub.s32 %s1217_s21, %s1725_s29 }
  0x40   : > { %p82_p11 = scmp.ne.s32.totalorder %s1185_s13, %s1181_s12  ;;  %p39_p12 = scmp.eq.s32.totalorder %s38_s28, 0 }
  0x41   : > { %s1685_s24 = scalar_select %p1399_p1, 1, 0 }
  0x42   : > { %s66_s15 = sor.u32 %s65_s30, %s38_s28  ;;  %p1409_p2 = por %p82_p11, %p55_p10 }
  0x43   : > { %p67_p0 = scmp.eq.s32.totalorder %s66_s15, 0  ;;  %p136_p9 = scmp.eq.s32.totalorder %s1378_s26, 7 }
  0x44   : > { %s1686_s4 = scalar_select %p1409_p2, 1, 0 }
  0x45   : > { %s1414_s6 = scalar_select %p39_p12, %s1201_s17, %s41_s5  }
  0x46   : > { %s1419_s27 = scalar_select %p67_p0, %s1189_s14, %s69_s25  }
  0x47   : > { %1687 = sst [smem:[#allocation17_spill]] %s1414_s6  ;;  %p142_p13 = scmp.eq.s32.totalorder %s696_s8, 7 }
  0x48   : > { %1688 = sst [smem:[#allocation18_spill]] %s1419_s27  ;;  %s162_s1 = sand.u32 1, %s1201_s17  }
  0x49   : > { %s720_s29 = sshll.u32 %s1217_s21, 7  ;;  %p1689_p3 = scmp.ne.s32.totalorder %s1189_s14, %s1185_s13 }
  0x4a   : > { %p1431_p7 = por %p142_p13, %p82_p11  ;;  %s699_s28 = sshll.u32 %s162_s1, 3 }
  0x4b   : > { %p1427_p6 = por %p136_p9, %p1689_p3  ;;  %s1693_s0 = sld [smem:[#allocation20_spill]] }
  0x4c   : > { %s1691_s30 = scalar_select %p1431_p7, 1, 0 }
  0x4d   : > { %s1690_s23 = scalar_select %p1427_p6, 1, 0 }
  0x4e   : > { %1692 = sst [smem:[#allocation19_spill]] %s1691_s30  ;;  %s166_s25 = scalar_lea.vmem [#allocation2], %s699_s28 }
  0x4f   : > { %s174_s8 = sshll.u32 %s166_s25, 4  ;;  %p1694_p10 = scmp.lt.s32.totalorder %s1221_s22, 8  ;;  %s1448_s8 = int_to_ptr.vmem [resolvable:$true] %s174_s8 }
  0x50   : > { %s1696_s27 = sand.u32 1, %s1189_s14  }
  0x51   : > { %s1438_s6 = scalar_lea.hbm %s1693_s0, %s720_s29  ;;  %p1444_p12 = pnand %p1694_p10, %p1392_p8 }
  0x52   : > { %s1452_s15 = sshll.u32 %s1696_s27, 3  ;;  %s163_s29 = scalar_lea.sflag [#allocation3], %s162_s1 }
  0x53   : > { %s1035_s5 = scalar_lea.hbm %s1438_s6, 128  ;;  %p1037_p0 = pneg %p1444_p12 }
  0x54   : > { %p1036_p11 = scmp.ne.s32.totalorder %s1438_s6, %s1035_s5  ;;  %s1040_s25 = scalar_lea.hbm %s1693_s0, 512 }
  0x55   : > { %p1041_p8 = scmp.lt.u32.totalorder %s1438_s6, %s1693_s0  ;;  %p1042_p3 = scmp.lt.u32.totalorder %s1040_s25, %s1035_s5 }
  0x56   : > { %p1038_p9 = pnand %p1037_p0, %p1036_p11  ;;  %p1044_p7 = scmp.lt.u32.totalorder %s1035_s5, %s1438_s6 }
  0x57   : > { %p1043_p10 = por %p1042_p3, %p1041_p8 }
  0x58   : > { %p1039_p13 = pneg %p1038_p9 }
  0x59   : > { %p1045_p6 = por %p1044_p7, %p1043_p10 }
  0x5b   : > { %p1046_p2 = pnand %p1045_p6, %p1039_p13 }
  0x5d   : > { %1049 = shalt.err (!%p1046_p2)
}
  0x5e   : > { %s1050_s1 = scalar_lea.vmem %s1448_s8, 128  ;;  %s1227_s27 = smov [#allocation2]  }
  0x5f   : > { %p1051_p11 = scmp.ne.s32.totalorder %s1448_s8, %s1050_s1  ;;  %s1055_s9 = sshll.u32 %s1227_s27, 4  ;;  %s1056_s9 = int_to_ptr.vmem [resolvable:$false] %s1055_s9 }
  0x60   : > { %s1057_s12 = scalar_lea.vmem %s1056_s9, 256  ;;  %p1058_p4 = scmp.lt.s32.totalorder %s1448_s8, %s1056_s9 }
  0x61   : > { %p1053_p9 = pnand %p1051_p11, %p1037_p0  ;;  %p1059_p8 = scmp.lt.s32.totalorder %s1057_s12, %s1050_s1 }
  0x63   : > { %p1054_p1 = pneg %p1053_p9  ;;  %p1060_p3 = por %p1059_p8, %p1058_p4 }
  0x65   : > { %p1061_p7 = pnand %p1060_p3, %p1054_p1 }
  0x67   : > { %1064 = shalt.err (!%p1061_p7)
}
  0x68   : > { %833 = dma.hbm_to_vmem [thread:$0]  (!%p1444_p12), %s1438_s6, 128, %s1448_s8, %s163_s29  }
  0x69   : > { %s706_s30 = sshll.u32 %s1217_s21, 1  ;;  %s207_s5 = scalar_lea.vmem [#allocation7], %s1452_s15 }
  0x6a   : > { %s216_s28 = sshll.u32 %s207_s5, 4  ;;  %s212_s25 = sadd.s32 %s1213_s20, %s706_s30  ;;  %s1482_s28 = int_to_ptr.vmem [resolvable:$true] %s216_s28 }
  0x6b   : > { %s707_s27 = sshll.u32 %s212_s25, 7  ;;  %p1697_p1 = pneg %p1339_p5 }
  0x6c   : > { %s214_s12 = scalar_lea.hbm %s1656_s2, %s707_s27  ;;  %s1070_s6 = scalar_lea.hbm %s1656_s2, 1024 }
  0x6d   : > { %s1065_s0 = scalar_lea.hbm %s214_s12, 128  ;;  %p1071_p12 = scmp.lt.u32.totalorder %s214_s12, %s1656_s2 }
  0x6e   : > { %p1066_p4 = scmp.ne.s32.totalorder %s214_s12, %s1065_s0  ;;  %p1072_p0 = scmp.lt.u32.totalorder %s1070_s6, %s1065_s0 }
  0x6f   : > { %p1074_p10 = scmp.lt.u32.totalorder %s1065_s0, %s214_s12 }
  0x70   : > { %p1068_p2 = pnand %p1066_p4, %p1697_p1  ;;  %p1073_p13 = por %p1072_p0, %p1071_p12 }
  0x72   : > { %p1069_p6 = pneg %p1068_p2  ;;  %p1075_p11 = por %p1074_p10, %p1073_p13 }
  0x74   : > { %p1076_p9 = pnand %p1075_p11, %p1069_p6 }
  0x76   : > { %1079 = shalt.err (!%p1076_p9)
}
  0x77   : > { %s1080_s29 = scalar_lea.vmem %s1482_s28, 128  ;;  %p1698_p3 = pmov %p1697_p1 }
  0x78   : > { %p1081_p8 = scmp.ne.s32.totalorder %s1482_s28, %s1080_s29  ;;  %s1228_s14 = smov [#allocation7]  }
  0x79   : > { %s1085_s30 = sshll.u32 %s1228_s14, 4  ;;  %s1086_s30 = int_to_ptr.vmem [resolvable:$false] %s1085_s30 }
  0x7a   : > { %p1083_p7 = pnand %p1081_p8, %p1698_p3  ;;  %s1087_s5 = scalar_lea.vmem %s1086_s30, 256 }
  0x7b   : > { %p1088_p1 = scmp.lt.s32.totalorder %s1482_s28, %s1086_s30  ;;  %p1089_p2 = scmp.lt.s32.totalorder %s1087_s5, %s1080_s29 }
  0x7c   : > { %p1084_p4 = pneg %p1083_p7 }
  0x7d   : > { %p1090_p12 = por %p1089_p2, %p1088_p1 }
  0x7f   : > { %p1091_p0 = pnand %p1090_p12, %p1084_p4 }
  0x81   : > { %1094 = shalt.err (!%p1091_p0)
}
  0x82   : > { %839 = dma.hbm_to_vmem [thread:$0]  (!%p1339_p5), %s214_s12, 128, %s1482_s28, %s1343_s11  }
  0x83   : > { %p1699_p6 = scmp.ne.s32.totalorder %s1681_s7, 0 }
  0x84   : > { %s227_s0 = sand.u32 (!%p1699_p6), 1, %s1197_s16   ;;  %p1700_p13 = scmp.ne.s32.totalorder (!%p1699_p6), %s1685_s24, 0 }
  0x85   : > { %225 = sbr.rel (%p1699_p6) target bundleno = 434 (0x1b2), region = 32  ;;  %s1509_s25 = sshll.u32 (!%p1699_p6), %s227_s0, 3 }
  0x86   : > { %s228_s27 = scalar_lea.sflag (!%p1699_p6), [#allocation3], %s227_s0  ;;  %s231_s1 = scalar_lea.vmem (!%p1699_p6), [#allocation2], %s1509_s25 }
  0x8c   : > { %1168 = dma.done.wait (%p1700_p13), %s228_s27, 128  }
  0x8d   : > { %1170 = vsyncadd (%p1700_p13), %s228_s27, 4294967168  ;;  %s236_s10 = sand.u32 1, %s1378_s26   ;;  %s1518_s11 = sand.u32 1, %s1185_s13  }
  0x8e   : > { %s710_s7 = sshll.u32 %s1518_s11, 7  ;;  %s237_s28 = scalar_lea.sflag [#allocation6], %s236_s10 }
  0x8f   : > { %s1521_s9 = scalar_lea.vmem [#allocation5], %s710_s7  ;;  %p1701_p5 = scmp.ne.s32.totalorder %s1686_s4, 0 }
  0x91   : > { %1172 = dma.done.wait (%p1701_p5), %s237_s28, 2176  }
  0x92   : > { %1174 = vsyncadd (%p1701_p5), %s237_s28, 4294965120  ;;  %v792_v0 = vld [vmem:[%s1521_s9 + $0x40] sm:$0xff]   ;;  %v793_v2 = vld [vmem:[%s1521_s9 + $0x48] sm:$0xff]   ;;  %s711_s26 = sshll.u32 %s1518_s11, 3  ;;  %s716_s24 = sshll.u32 %s1209_s19, 1 }
  0x93   : > { %v722_v1 = vld [vmem:[%s1521_s9] sm:$0xff]   ;;  %v755_v3 = vunpack.c.l.bf16 %v792_v0  ;;  %v756_v4 = vunpack.c.h.bf16 %v792_v0  ;;  %v785_v7 = vld [vmem:[%s1521_s9 + $0x8] sm:$0xff]   ;;  %v759_v8 = vunpack.c.l.bf16 %v793_v2  ;;  %v760_v9 = vunpack.c.h.bf16 %v793_v2  ;;  %v794_v12 = vld [vmem:[%s1521_s9 + $0x50] sm:$0xff]   ;;  %s561_s4 = sadd.s32 %s1205_s18, %s716_s24  ;;  %s249_s12 = scalar_lea.vmem [#allocation7], %s711_s26 }
  0x94   : > { %v723_v5 = vunpack.c.l.bf16 %v722_v1  ;;  %v724_v6 = vunpack.c.h.bf16 %v722_v1  ;;  %v727_v10 = vunpack.c.l.bf16 %v785_v7  ;;  %v728_v11 = vunpack.c.h.bf16 %v785_v7  ;;  %v786_v21 = vld [vmem:[%s1521_s9 + $0x10] sm:$0xff]   ;;  %v795_v22 = vld [vmem:[%s1521_s9 + $0x58] sm:$0xff]   ;;  %v796_v47 = vld [vmem:[%s1521_s9 + $0x60] sm:$0xff]   ;;  %s717_s17 = sshll.u32 %s561_s4, 7  ;;  %s281_s6 = scalar_lea.vmem [#allocation8], %s711_s26 }
  0x95   : > { %v363_v13 = vmul.f32 -2.0, %v755_v3  ;;  %v364_v14 = vmul.f32 -2.0, %v756_v4  ;;  %v365_v17 = vmul.f32 -2.0, %v759_v8  ;;  %v366_v18 = vmul.f32 -2.0, %v760_v9  ;;  %v787_v37 = vld [vmem:[%s1521_s9 + $0x18] sm:$0xff]   ;;  %v788_v51 = vld [vmem:[%s1521_s9 + $0x20] sm:$0xff]   ;;  %s1591_s19 = scalar_lea.hbm %s1657_s3, %s717_s17 }
  0x96   : > { %v347_v15 = vmul.f32 -2.0, %v723_v5  ;;  %v348_v16 = vmul.f32 -2.0, %v724_v6  ;;  %v349_v19 = vmul.f32 -2.0, %v727_v10  ;;  %v350_v20 = vmul.f32 -2.0, %v728_v11  ;;  %v797_v58 = vld [vmem:[%s1521_s9 + $0x68] sm:$0xff]   ;;  %s565_s8 = sshll.u32 %s281_s6, 4  ;;  %s1593_s8 = int_to_ptr.vmem [resolvable:$true] %s565_s8 }
  0x97   : > { %v411_v23 = vmul.f32 1.442695, %v363_v13  ;;  %v413_v24 = vmul.f32 1.442695, %v364_v14  ;;  %v763_v26 = vunpack.c.l.bf16 %v794_v12  ;;  %v415_v28 = vmul.f32 1.442695, %v365_v17 }
  0x98   : > { %v379_v25 = vmul.f32 1.442695, %v347_v15  ;;  %v381_v27 = vmul.f32 1.442695, %v348_v16  ;;  %v417_v29 = vmul.f32 1.442695, %v366_v18  ;;  %v764_v30 = vunpack.c.h.bf16 %v794_v12 }
  0x99   : > { %939 = vpow2.f32 %v411_v23  ;;  %v383_v31 = vmul.f32 1.442695, %v349_v19  ;;  %v385_v32 = vmul.f32 1.442695, %v350_v20  ;;  %v367_v33 = vmul.f32 -2.0, %v763_v26  ;;  %v789_v5 = vld [vmem:[%s1521_s9 + $0x28] sm:$0xff]  }
  0x9a   : > { %941 = vpow2.f32 %v413_v24  ;;  %v368_v34 = vmul.f32 -2.0, %v764_v30  ;;  %v731_v35 = vunpack.c.l.bf16 %v786_v21  ;;  %v732_v36 = vunpack.c.h.bf16 %v786_v21  ;;  %v798_v18 = vld [vmem:[%s1521_s9 + $0x70] sm:$0xff]   ;;  %s550_s18 = scalar_lea.sflag [#allocation4], %s1518_s11  ;;  %s1095_s14 = scalar_lea.vmem %s1593_s8, 128 }
  0x9b   : > { %943 = vpow2.f32 %v379_v25  ;;  %v419_v38 = vmul.f32 1.442695, %v367_v33  ;;  %v767_v39 = vunpack.c.l.bf16 %v795_v22  ;;  %v768_v40 = vunpack.c.h.bf16 %v795_v22  ;;  %p1096_p10 = scmp.ne.s32.totalorder %s1593_s8, %s1095_s14  ;;  %p1702_p11 = scmp.ne.s32.totalorder %s1690_s23, 0 }
  0x9c   : > { %945 = vpow2.f32 %v381_v27  ;;  %v421_v41 = vmul.f32 1.442695, %v368_v34  ;;  %v351_v42 = vmul.f32 -2.0, %v731_v35  ;;  %v352_v43 = vmul.f32 -2.0, %v732_v36  ;;  %s1229_s30 = smov [#allocation8]  }
  0x9d   : > { %947 = vpow2.f32 %v415_v28  ;;  %v369_v44 = vmul.f32 -2.0, %v767_v39  ;;  %v370_v45 = vmul.f32 -2.0, %v768_v40  ;;  %v735_v46 = vunpack.c.l.bf16 %v787_v37  ;;  %p1097_p9 = pnand %p1096_p10, %p1702_p11  ;;  %s1099_s5 = sshll.u32 %s1229_s30, 4  ;;  %s1100_s5 = int_to_ptr.vmem [resolvable:$false] %s1099_s5 }
  0x9e   : > { %949 = vpow2.f32 %v417_v29  ;;  %v387_v48 = vmul.f32 1.442695, %v351_v42  ;;  %v389_v49 = vmul.f32 1.442695, %v352_v43  ;;  %v736_v50 = vunpack.c.h.bf16 %v787_v37  ;;  %s1101_s0 = scalar_lea.vmem %s1100_s5, 256  ;;  %p1102_p3 = scmp.lt.s32.totalorder %s1593_s8, %s1100_s5 }
  0x9f   : > { %951 = vpow2.f32 %v383_v31  ;;  %v423_v52 = vmul.f32 1.442695, %v369_v44  ;;  %v425_v53 = vmul.f32 1.442695, %v370_v45  ;;  %v353_v54 = vmul.f32 -2.0, %v735_v46  ;;  %v790_v31 = vld [vmem:[%s1521_s9 + $0x30] sm:$0xff]   ;;  %p1098_p8 = pneg %p1097_p9  ;;  %p1103_p7 = scmp.lt.s32.totalorder %s1101_s0, %s1095_s14 }
  0xa0   : > { %953 = vpow2.f32 %v385_v32  ;;  %v354_v55 = vmul.f32 -2.0, %v736_v50  ;;  %v771_v56 = vunpack.c.l.bf16 %v796_v47  ;;  %v772_v57 = vunpack.c.h.bf16 %v796_v47  ;;  %v799_v44 = vld [vmem:[%s1521_s9 + $0x78] sm:$0xff]  }
  0xa1   : > { %955 = vpow2.f32 %v419_v38  ;;  %v391_v59 = vmul.f32 1.442695, %v353_v54  ;;  %v739_v60 = vunpack.c.l.bf16 %v788_v51  ;;  %v740_v61 = vunpack.c.h.bf16 %v788_v51  ;;  %p1104_p4 = por %p1103_p7, %p1102_p3 }
  0xa2   : > { %957 = vpow2.f32 %v421_v41  ;;  %v393_v62 = vmul.f32 1.442695, %v354_v55  ;;  %v371_v63 = vmul.f32 -2.0, %v771_v56  ;;  %v372_v0 = vmul.f32 -2.0, %v772_v57  ;;  %v791_v57 = vld [vmem:[%s1521_s9 + $0x38] sm:$0xff]  }
  0xa3   : > { %v1538_v1 = vpop.eup %939  ;;  %959 = vpow2.f32 %v387_v48  ;;  %v355_v2 = vmul.f32 -2.0, %v739_v60  ;;  %v356_v3 = vmul.f32 -2.0, %v740_v61  ;;  %v775_v4 = vunpack.c.l.bf16 %v797_v58  ;;  %p1105_p1 = pnand %p1104_p4, %p1098_p8 }
  0xa4   : > { %v1541_v6 = vpop.eup %941  ;;  %961 = vpow2.f32 %v389_v49  ;;  %v427_v7 = vmul.f32 1.442695, %v371_v63  ;;  %v429_v8 = vmul.f32 1.442695, %v372_v0  ;;  %v776_v9 = vunpack.c.h.bf16 %v797_v58 }
  0xa5   : > { %v944_v10 = vpop.eup %943  ;;  %v490_v11 = vpack.c.bf16 %v1541_v6, %v1538_v1  ;;  %963 = vpow2.f32 %v423_v52  ;;  %v395_v12 = vmul.f32 1.442695, %v355_v2  ;;  %v397_v13 = vmul.f32 1.442695, %v356_v3 }
  0xa6   : > { %v946_v14 = vpop.eup %945  ;;  %965 = vpow2.f32 %v425_v53  ;;  %v373_v15 = vmul.f32 -2.0, %v775_v4  ;;  %v374_v16 = vmul.f32 -2.0, %v776_v9  ;;  %v743_v17 = vunpack.c.l.bf16 %v789_v5 }
  0xa7   : > { %v1546_v19 = vpop.eup %947  ;;  %800 = vmatprep.subr.bf16.mxu0 %v490_v11  ;;  %v443_v20 = vadd.f32 %v946_v14, %v944_v10  ;;  %v482_v21 = vpack.c.bf16 %v946_v14, %v944_v10  ;;  %967 = vpow2.f32 %v391_v59  ;;  %v744_v22 = vunpack.c.h.bf16 %v789_v5 }
  0xa8   : > { %v1548_v23 = vpop.eup %949  ;;  %969 = vpow2.f32 %v393_v62  ;;  %v431_v24 = vmul.f32 1.442695, %v373_v15  ;;  %v433_v25 = vmul.f32 1.442695, %v374_v16  ;;  %v357_v26 = vmul.f32 -2.0, %v743_v17 }
  0xa9   : > { %v952_v27 = vpop.eup %951  ;;  %801 = vmatpush3.bf16.msra.mxu0 %v482_v21  ;;  %v491_v28 = vpack.c.bf16 %v1548_v23, %v1546_v19  ;;  %971 = vpow2.f32 %v427_v7  ;;  %v358_v29 = vmul.f32 -2.0, %v744_v22  ;;  %v779_v30 = vunpack.c.l.bf16 %v798_v18 }
  0xaa   : > { %v954_v32 = vpop.eup %953  ;;  %v444_v33 = vadd.f32 %v952_v27, %v443_v20  ;;  %973 = vpow2.f32 %v429_v8  ;;  %v399_v34 = vmul.f32 1.442695, %v357_v26  ;;  %v780_v35 = vunpack.c.h.bf16 %v798_v18 }
  0xab   : > { %v1553_v36 = vpop.eup %955  ;;  %802 = vmatprep.subr.bf16.mxu0 %v491_v28  ;;  %v483_v37 = vpack.c.bf16 %v954_v32, %v952_v27  ;;  %975 = vpow2.f32 %v395_v12  ;;  %v401_v38 = vmul.f32 1.442695, %v358_v29  ;;  %v375_v39 = vmul.f32 -2.0, %v779_v30  ;;  %v481_v12 = vld [vmem:[%s231_s1] sm:$0xff] }
  0xac   : > { %v1555_v40 = vpop.eup %957  ;;  %v445_v41 = vadd.f32 %v954_v32, %v444_v33  ;;  %977 = vpow2.f32 %v397_v13  ;;  %v376_v42 = vmul.f32 -2.0, %v780_v35  ;;  %v747_v43 = vunpack.c.l.bf16 %v790_v31 }
  0xad   : > { %v960_v45 = vpop.eup %959  ;;  %803 = vmatpush3.bf16.msra.mxu0 %v483_v37  ;;  %v492_v46 = vpack.c.bf16 %v1555_v40, %v1553_v36  ;;  %979 = vpow2.f32 %v431_v24  ;;  %v435_v47 = vmul.f32 1.442695, %v375_v39  ;;  %v748_v48 = vunpack.c.h.bf16 %v790_v31 }
  0xae   : > { %v962_v49 = vpop.eup %961  ;;  %v446_v50 = vadd.f32 %v960_v45, %v445_v41  ;;  %981 = vpow2.f32 %v433_v25  ;;  %v437_v51 = vmul.f32 1.442695, %v376_v42  ;;  %v359_v52 = vmul.f32 -2.0, %v747_v43 }
  0xaf   : > { %v1560_v53 = vpop.eup %963  ;;  %804 = vmatprep.subr.bf16.mxu0 %v492_v46  ;;  %v484_v54 = vpack.c.bf16 %v962_v49, %v960_v45  ;;  %983 = vpow2.f32 %v399_v34  ;;  %v360_v55 = vmul.f32 -2.0, %v748_v48  ;;  %v783_v56 = vunpack.c.l.bf16 %v799_v44 }
  0xb0   : > { %v1563_v58 = vpop.eup %965  ;;  %v447_v59 = vadd.f32 %v962_v49, %v446_v50  ;;  %985 = vpow2.f32 %v401_v38  ;;  %v403_v60 = vmul.f32 1.442695, %v359_v52  ;;  %v784_v61 = vunpack.c.h.bf16 %v799_v44 }
  0xb1   : > { %v968_v62 = vpop.eup %967  ;;  %805 = vmatpush3.bf16.msra.mxu0 %v484_v54  ;;  %v493_v63 = vpack.c.bf16 %v1563_v58, %v1560_v53  ;;  %987 = vpow2.f32 %v435_v47  ;;  %v405_v0 = vmul.f32 1.442695, %v360_v55  ;;  %v377_v2 = vmul.f32 -2.0, %v783_v56 }
  0xb2   : > { %v970_v3 = vpop.eup %969  ;;  %v448_v4 = vadd.f32 %v968_v62, %v447_v59  ;;  %989 = vpow2.f32 %v437_v51  ;;  %v378_v5 = vmul.f32 -2.0, %v784_v61  ;;  %v751_v7 = vunpack.c.l.bf16 %v791_v57 }
  0xb3   : > { %v1567_v8 = vpop.eup %971  ;;  %806 = vmatprep.subr.bf16.mxu0 %v493_v63  ;;  %v485_v9 = vpack.c.bf16 %v970_v3, %v968_v62  ;;  %991 = vpow2.f32 %v403_v60  ;;  %v439_v10 = vmul.f32 1.442695, %v377_v2  ;;  %v752_v11 = vunpack.c.h.bf16 %v791_v57 }
  0xb4   : > { %v1571_v13 = vpop.eup %973  ;;  %v449_v14 = vadd.f32 %v970_v3, %v448_v4  ;;  %993 = vpow2.f32 %v405_v0  ;;  %v441_v15 = vmul.f32 1.442695, %v378_v5  ;;  %v361_v16 = vmul.f32 -2.0, %v751_v7 }
  0xb5   : > { %v976_v17 = vpop.eup %975  ;;  %807 = vmatpush3.bf16.msra.mxu0 %v485_v9  ;;  %v494_v18 = vpack.c.bf16 %v1571_v13, %v1567_v8  ;;  %995 = vpow2.f32 %v439_v10  ;;  %v362_v20 = vmul.f32 -2.0, %v752_v11  ;;  %v714_v25 = vcombine.high %v481_v12, %v481_v12 }
  0xb6   : > { %v978_v21 = vpop.eup %977  ;;  %v450_v22 = vadd.f32 %v976_v17, %v449_v14  ;;  %997 = vpow2.f32 %v441_v15  ;;  %v407_v24 = vmul.f32 1.442695, %v361_v16  ;;  %v713_v56 = vcombine.low %v481_v12, %v481_v12  ;;  %v546_v15 = vld [vmem:[%s249_s12] sm:$0xff] }
  0xb7   : > { %v980_v26 = vpop.eup %979  ;;  %808 = vmatprep.subr.bf16.mxu0 %v494_v18  ;;  %v486_v27 = vpack.c.bf16 %v978_v21, %v976_v17  ;;  %v409_v28 = vmul.f32 1.442695, %v362_v20  ;;  %537 = vmatprep.mubr.bf16.mxu0 %v714_v25 }
  0xb8   : > { %v982_v29 = vpop.eup %981  ;;  %v451_v30 = vadd.f32 %v978_v21, %v450_v22  ;;  %999 = vpow2.f32 %v407_v24 }
  0xb9   : > { %v984_v31 = vpop.eup %983  ;;  %809 = vmatpush3.bf16.msra.mxu0 %v486_v27  ;;  %v495_v32 = vpack.c.bf16 %v982_v29, %v980_v26  ;;  %1001 = vpow2.f32 %v409_v28 }
  0xba   : > { %v986_v33 = vpop.eup %985  ;;  %v452_v34 = vadd.f32 %v984_v31, %v451_v30 }
  0xbb   : > { %v988_v35 = vpop.eup %987  ;;  %810 = vmatprep.subr.bf16.mxu0 %v495_v32  ;;  %v487_v37 = vpack.c.bf16 %v986_v33, %v984_v31 }
  0xbc   : > { %v990_v38 = vpop.eup %989  ;;  %v453_v39 = vadd.f32 %v986_v33, %v452_v34 }
  0xbd   : > { %v992_v41 = vpop.eup %991  ;;  %811 = vmatpush3.bf16.msra.mxu0 %v487_v37  ;;  %v496_v42 = vpack.c.bf16 %v990_v38, %v988_v35 }
  0xbe   : > { %v994_v43 = vpop.eup %993  ;;  %v454_v44 = vadd.f32 %v992_v41, %v453_v39 }
  0xbf   : > { %v996_v45 = vpop.eup %995  ;;  %812 = vmatprep.subr.bf16.mxu0 %v496_v42  ;;  %v488_v46 = vpack.c.bf16 %v994_v43, %v992_v41 }
  0xc0   : > { %v998_v47 = vpop.eup %997  ;;  %v455_v48 = vadd.f32 %v994_v43, %v454_v44 }
  0xc1   : > { %813 = vmatpush3.bf16.msra.mxu0 %v488_v46  ;;  %v497_v49 = vpack.c.bf16 %v998_v47, %v996_v45 }
  0xc2   : > { %v1000_v50 = vpop.eup %999 }
  0xc3   : > { %v1002_v51 = vpop.eup %1001  ;;  %814 = vmatprep.subr.bf16.mxu0 %v497_v49  ;;  %v456_v52 = vadd.f32 %v1000_v50, %v455_v48 }
  0xc4   : > { %v489_v54 = vpack.c.bf16 %v1002_v51, %v1000_v50 }
  0xc5   : > { %v457_v55 = vadd.f32 %v1002_v51, %v456_v52 }
  0xc6   : > { %815 = vmatpush3.bf16.msra.mxu0 %v489_v54 }
  0xc7   : > { %v458_v57 = vadd.f32 %v1538_v1, %v457_v55 }
  0xc9   : > { %v459_v59 = vadd.f32 %v1541_v6, %v458_v57  ;;  %538 = vmatmul.mubr.bf16.vlgmr.msra.gmra.mrb[0].mxu0 %v713_v56 }
  0xcb   : > { %v460_v60 = vadd.f32 %v1546_v19, %v459_v59 }
  0xcd   : > { %v461_v61 = vadd.f32 %v1548_v23, %v460_v60 }
  0xcf   : > { %v462_v62 = vadd.f32 %v1553_v36, %v461_v61 }
  0xd1   : > { %v463_v63 = vadd.f32 %v1555_v40, %v462_v62 }
  0xd3   : > { %v464_v0 = vadd.f32 %v1560_v53, %v463_v63 }
  0xd5   : > { %v465_v2 = vadd.f32 %v1563_v58, %v464_v0 }
  0xd7   : > { %v466_v3 = vadd.f32 %v1567_v8, %v465_v2 }
  0xd9   : > { %v467_v1 = vadd.f32 %v1571_v13, %v466_v3 }
  0xdb   : > { %v468_v6 = vadd.f32 %v980_v26, %v467_v1 }
  0xdd   : > { %v469_v4 = vadd.f32 %v982_v29, %v468_v6 }
  0xdf   : > { %v470_v19 = vadd.f32 %v988_v35, %v469_v4 }
  0xe1   : > { %v471_v5 = vadd.f32 %v990_v38, %v470_v19 }
  0xe3   : > { %v472_v23 = vadd.f32 %v996_v45, %v471_v5 }
  0xe5   : > { %v473_v7 = vadd.f32 %v998_v47, %v472_v23 }
  0xe7   : > { %v474_v36 = vrot.slane %v473_v7, 4 }
  0xe9   : > { %v475_v9 = vadd.f32 %v474_v36, %v473_v7 }
  0xeb   : > { %v476_v40 = vrot.slane %v475_v9, 2 }
  0xed   : > { %v477_v10 = vadd.f32 %v476_v40, %v475_v9 }
  0xef   : > { %v478_v53 = vrot.slane %v477_v10, 1 }
  0xf1   : > { %v479_v11 = vadd.f32 %v478_v53, %v477_v10 }
  0xf3   : > { %1003 = vrcp.f32 %v479_v11 }
  0xfd   : > { %v1004_v8 = vpop.eup %1003 }
 0x19c   : > { %v816_v58 = vpop.f32.mrb[0].mxu0 }
 0x19d   : > { %v817_v12 = vpop.f32.mrb[1].mxu0 }
 0x19e   : > { %v818_v13 = vadd.f32 %v817_v12, %v816_v58  ;;  %v819_v14 = vpop.f32.mrb[2].mxu0 }
 0x19f   : > { %v820_v16 = vpop.f32.mrb[3].mxu0 }
 0x1a0   : > { %v545_v17 = vmul.f32 %v1004_v8, %v818_v13 }
 0x1a2   : > { %v547_v18 = vadd.f32 %v546_v15, %v545_v17 }
 0x1a4   : > { %548 = vst [vmem:[%s281_s6] sm:$0xff] %v547_v18 }
 0x1a5   : > { %1108 = shalt.err (!%p1105_p1)
}
 0x1a6   : > { %s1109_s25 = scalar_lea.hbm %s1591_s19, 128  ;;  %s1113_s10 = scalar_lea.hbm %s1657_s3, 1024 }
 0x1a7   : > { %p1110_p2 = scmp.ne.s32.totalorder %s1591_s19, %s1109_s25  ;;  %p1114_p6 = scmp.lt.u32.totalorder %s1591_s19, %s1657_s3 }
 0x1a8   : > { %p1115_p13 = scmp.lt.u32.totalorder %s1113_s10, %s1109_s25  ;;  %p1117_p10 = scmp.lt.u32.totalorder %s1109_s25, %s1591_s19 }
 0x1a9   : > { %p1111_p12 = pnand %p1110_p2, %p1702_p11 }
 0x1aa   : > { %p1116_p5 = por %p1115_p13, %p1114_p6 }
 0x1ab   : > { %p1112_p0 = pneg %p1111_p12 }
 0x1ac   : > { %p1118_p9 = por %p1117_p10, %p1116_p5 }
 0x1ae   : > { %p1119_p8 = pnand %p1118_p9, %p1112_p0 }
 0x1b0   : > { %1122 = shalt.err (!%p1119_p8)
}
 0x1b1   : > { %828 = dma.vmem_to_hbm [thread:$0]  (%p1702_p11), %s1593_s8, 128, %s1591_s19, %s550_s18  }
 0x1b2 PF: > { %s1703_s28 = sld [smem:[#allocation12_spill]]  ;;  %s1704_s9 = sld [smem:[#allocation19_spill]] }
 0x1b3   : > { %p845_p3 = scmp.ge.s32.totalorder %s1221_s22, 2 }
 0x1b8   : > { %s577_s26 = sand.u32 1, %s1703_s28   ;;  %p1705_p7 = scmp.ne.s32.totalorder %s1704_s9, 0 }
 0x1b9   : > { %s578_s24 = scalar_lea.sflag [#allocation4], %s577_s26 }
 0x1ba   : > { %p841_p4 = pnand %p845_p3, %p1705_p7 }
 0x1bc   : > { %1176 = dma.done.wait (!%p841_p4), %s578_s24, 128  }
 0x1bd   : > { %1178 = vsyncadd (!%p841_p4), %s578_s24, 4294967168  ;;  %s22_s22 = sadd.s32 1, %s1221_s22   ;;  %s1706_s4 = sld [smem:[#allocation13_spill]] }
 0x1be   : > { %p19_p1 = scmp.ge.s32.totalorder %s22_s22, 10   ;;  %s1707_s14 = sld [smem:[#allocation18_spill]] }
 0x1bf   : > { %s1708_s23 = sld [smem:[#allocation14_spill]]  ;;  %s1709_s17 = sld [smem:[#allocation17_spill]] }
 0x1c0   : > { %s1710_s6 = sld [smem:[#allocation15_spill]]  ;;  %s1711_s8 = sld [smem:[#allocation16_spill]] }
 0x1c1   : > { %s1712_s12 = smov %s1185_s13  ;;  %s1714_s15 = smov %s1197_s16 }
 0x1c2   : > { %s1716_s18 = smov %s1213_s20  ;;  %s1717_s19 = smov %s1217_s21 }
 0x1c3   : > { %s1713_s13 = smov %s1706_s4  ;;  %21 = sbr.rel (!%p19_p1) target bundleno = 14 (0xe), region = 101 }
 0x1c5   : > { %s1715_s16 = smov %s1708_s23 }
 0x1c6   : > { %s1718_s20 = smov %s1710_s6  ;;  %s1719_s21 = smov %s1711_s8 }
 0x1ca   :  { %583 = vsyncpa [#allocation3], 1 }
 0x1cb   :  { %585 = vsyncpa [#allocation3 + $0x1], 1 }
 0x1cc   :  { %586 = vsyncpa [#allocation6], 1 }
 0x1cd   :  { %588 = vsyncpa [#allocation6 + $0x1], 1 }
 0x1ce   :  { %589 = vsyncpa [#allocation4], 1 }
 0x1cf   :  { %591 = vsyncpa [#allocation4 + $0x1], 1 }

</bundles_post_ra>
